<compile_context>
chip_gen: v7x
topology: tpu7x:2x2x1
jax: 0.10.0
libtpu: 0.0.40
codegen_flags: <defaults>
</compile_context>

<pallas_src>
import functools

import jax
import jax.numpy as jnp
from jax.experimental import pallas as pl
from jax.experimental.pallas import tpu as pltpu

LANE = 128  # TPU lane width: feature dims are padded to a multiple of this.


def _round_up(n, m):
    return ((n + m - 1) // m) * m


def _pick_tm(batch):
    """Adaptive batch tile: big enough to amortize per-step overhead (~0.35us)
    and hit the HBM roofline, small enough that (a) tiny batches aren't padded
    to a huge tile and (b) the grid has >=2 tiles for v7x's two TensorCores."""
    tm = min(512, _round_up(max(batch, 1), LANE))
    if batch > LANE:
        # Ensure at least two grid steps so the "parallel" axis can be split
        # across TensorCores on v7x (no effect on single-TC v5e/v6e).
        tm = min(tm, max(LANE, _round_up(-(-batch // 2), LANE)))
    return tm


def mlp_kernel(x_ref,
               w1_ref, b1_ref,
               w2_ref, b2_ref,
               w3_ref, b3_ref,
               w4_ref, b4_ref,
               o_ref):
    # Dropout(p=0.1) layers use eval-mode (identity) semantics.
    # Cast the input tile to bf16 in-kernel (no-op if already bf16); the VPU
    # cast is hidden under the MXU work that follows.
    x = x_ref[...].astype(jnp.bfloat16)

    # Layer 1: Linear (bf16 in, f32 acc) + bias + ReLU
    h = jnp.dot(x, w1_ref[...], preferred_element_type=jnp.float32)
    h = jnp.maximum(h + b1_ref[...], 0.0).astype(jnp.bfloat16)
    # Layer 2
    h = jnp.dot(h, w2_ref[...], preferred_element_type=jnp.float32)
    h = jnp.maximum(h + b2_ref[...], 0.0).astype(jnp.bfloat16)
    # Layer 3
    h = jnp.dot(h, w3_ref[...], preferred_element_type=jnp.float32)
    h = jnp.maximum(h + b3_ref[...], 0.0).astype(jnp.bfloat16)
    # Output layer: Linear (no activation), lane-dense store in o_ref.dtype.
    out = jnp.dot(h, w4_ref[...], preferred_element_type=jnp.float32) + b4_ref[...]
    o_ref[...] = out.astype(o_ref.dtype)


def prepare_params(params):
    """Zero-pad weights/biases to lane-dense (multiple-of-128) feature dims.

    Weights are cast to bf16 once here (f32 accumulation happens in-kernel);
    biases stay f32 and are added post-accumulation. Padded rows/columns are
    exactly zero so padded lanes contribute nothing to real outputs.
    """
    prepared = {}
    for i in range(1, 5):
        w = params[f"w{i}"]          # (fan_in, fan_out), pre-transposed
        b = params[f"b{i}"]          # (1, fan_out)
        in_p = _round_up(w.shape[0], LANE)
        out_p = _round_up(w.shape[1], LANE)
        w_pad = jnp.zeros((in_p, out_p), jnp.float32)
        w_pad = w_pad.at[: w.shape[0], : w.shape[1]].set(w)
        b_pad = jnp.zeros((1, out_p), jnp.float32)
        b_pad = b_pad.at[:, : b.shape[1]].set(b)
        prepared[f"w{i}"] = w_pad.astype(jnp.bfloat16)
        prepared[f"b{i}"] = b_pad
    return prepared


@functools.partial(jax.jit, static_argnames=("output_n", "out_dtype"))
def net_forward(x, padded_params, output_n, out_dtype=jnp.bfloat16):
    """x: (B, input_n) f32. padded_params: output of prepare_params()."""
    B, input_n = x.shape
    in_p = padded_params["w1"].shape[0]
    hidden_p = padded_params["w2"].shape[0]
    out_p = padded_params["w4"].shape[1]

    tm = _pick_tm(B)
    b_pad = _round_up(max(B, 1), tm)
    grid = (b_pad // tm,)

    # Only materialize a padded copy of x when actually required; otherwise
    # stream the caller's f32 array directly and cast in-kernel.
    needs_pad = (input_n != in_p) or (b_pad != B)
    if needs_pad:
        x_in = jnp.zeros((b_pad, in_p), jnp.bfloat16)
        x_in = x_in.at[:B, :input_n].set(x.astype(jnp.bfloat16))
    else:
        x_in = x  # f32 pass-through; kernel casts to bf16 before the first dot

    args = (x_in,
            padded_params["w1"], padded_params["b1"],
            padded_params["w2"], padded_params["b2"],
            padded_params["w3"], padded_params["b3"],
            padded_params["w4"], padded_params["b4"])

    def full_spec(a):
        # Constant index_map -> block stays VMEM-resident across all grid steps.
        return pl.BlockSpec(a.shape, lambda i: (0,) * a.ndim)

    in_specs = [pl.BlockSpec((tm, in_p), lambda i: (i, 0))]
    in_specs += [full_spec(a) for a in args[1:]]

    # VMEM budget: resident params + double-buffered x/out tiles + f32
    # intermediates, with headroom; clamped to [32 MiB (v5e default is only
    # 16 MiB), 48 MiB (leave slack under v7x's 64 MiB physical)].
    weight_bytes = sum(int(a.size) * a.dtype.itemsize for a in args[1:])
    x_tile_bytes = tm * in_p * jnp.dtype(x_in.dtype).itemsize
    out_tile_bytes = tm * out_p * jnp.dtype(out_dtype).itemsize
    act_bytes = 3 * tm * hidden_p * 4
    vmem_est = weight_bytes + 2 * (x_tile_bytes + out_tile_bytes) + act_bytes
    vmem_limit = int(min(max(2 * vmem_est, 32 * 1024 * 1024), 48 * 1024 * 1024))

    flops = 2 * b_pad * (in_p * hidden_p + 2 * hidden_p * hidden_p
                         + hidden_p * out_p)
    bytes_accessed = (b_pad * in_p * jnp.dtype(x_in.dtype).itemsize
                      + b_pad * out_p * jnp.dtype(out_dtype).itemsize
                      + weight_bytes)

    out_pad = pl.pallas_call(
        mlp_kernel,
        out_shape=jax.ShapeDtypeStruct((b_pad, out_p), out_dtype),
        grid=grid,
        in_specs=in_specs,
        out_specs=pl.BlockSpec((tm, out_p), lambda i: (i, 0)),
        compiler_params=pltpu.CompilerParams(
            dimension_semantics=("parallel",),   # megacore / 2-TC sharding on v7x
            vmem_limit_bytes=vmem_limit,
        ),
        cost_estimate=pl.CostEstimate(
            flops=flops, transcendentals=0, bytes_accessed=bytes_accessed),
    )(*args)

    return out_pad[:B, :output_n]


def init_params(key, input_n, hidden_n, output_n):
    """PyTorch nn.Linear-style init: U(-1/sqrt(fan_in), 1/sqrt(fan_in)).
    Weights are stored pre-transposed as (in_features, out_features)."""
    dims = [(input_n, hidden_n), (hidden_n, hidden_n),
            (hidden_n, hidden_n), (hidden_n, output_n)]
    params = {}
    for i, (fan_in, fan_out) in enumerate(dims, start=1):
        key, kw, kb = jax.random.split(key, 3)
        bound = 1.0 / jnp.sqrt(jnp.float32(fan_in))
        params[f"w{i}"] = jax.random.uniform(
            kw, (fan_in, fan_out), jnp.float32, minval=-bound, maxval=bound)
        params[f"b{i}"] = jax.random.uniform(
            kb, (1, fan_out), jnp.float32, minval=-bound, maxval=bound)
    return params


def reference_forward(x, params):
    h = jnp.maximum(x @ params["w1"] + params["b1"], 0.0)
    h = jnp.maximum(h @ params["w2"] + params["b2"], 0.0)
    h = jnp.maximum(h @ params["w3"] + params["b3"], 0.0)
    return h @ params["w4"] + params["b4"]


if __name__ == "__main__":
    key = jax.random.PRNGKey(0)
    key, kx, kx2 = jax.random.split(key, 3)

    batch, input_n, hidden_n, output_n = 8, 16, 32, 8
    x = jax.random.normal(kx, (batch, input_n), jnp.float32)
    params = init_params(key, input_n, hidden_n, output_n)
    padded_params = prepare_params(params)

    out = net_forward(x, padded_params, output_n=output_n)
    out = jax.block_until_ready(out)

    ref = reference_forward(x, params)
    assert out.shape == (batch, output_n)
    # bf16 matmul inputs / bf16 output with f32 accumulation -> looser tolerance.
    assert jnp.allclose(out.astype(jnp.float32), ref, atol=2e-2, rtol=2e-2), (
        f"max abs err = {jnp.max(jnp.abs(out.astype(jnp.float32) - ref))}")

    # Second (still small) check exercising the multi-tile / padded-batch path.
    batch2 = 384
    x2 = jax.random.normal(kx2, (batch2, input_n), jnp.float32)
    out2 = jax.block_until_ready(net_forward(x2, padded_params, output_n=output_n))
    ref2 = reference_forward(x2, params)
    assert out2.shape == (batch2, output_n)
    assert jnp.allclose(out2.astype(jnp.float32), ref2, atol=2e-2, rtol=2e-2), (
        f"max abs err = {jnp.max(jnp.abs(out2.astype(jnp.float32) - ref2))}")

    print("KERNEL_OK")
</pallas_src>

<mosaic_0001>
module attributes {stable_mosaic.version = 11 : i64} {
  func.func @mlp_kernel(%arg0: i32, %arg1: memref<128x128xbf16, #tpu.memory_space<vmem>>, %arg2: memref<128x128xbf16, #tpu.memory_space<vmem>>, %arg3: memref<1x128xf32, #tpu.memory_space<vmem>>, %arg4: memref<128x128xbf16, #tpu.memory_space<vmem>>, %arg5: memref<1x128xf32, #tpu.memory_space<vmem>>, %arg6: memref<128x128xbf16, #tpu.memory_space<vmem>>, %arg7: memref<1x128xf32, #tpu.memory_space<vmem>>, %arg8: memref<128x128xbf16, #tpu.memory_space<vmem>>, %arg9: memref<1x128xf32, #tpu.memory_space<vmem>>, %arg10: memref<128x128xbf16, #tpu.memory_space<vmem>>) attributes {dimension_semantics = [#tpu.dimension_semantics<parallel>], iteration_bounds = array<i64: 1>, scalar_prefetch = 0 : i64, scratch_operands = 0 : i64, tpu.core_type = #tpu.core_type<tc>, window_params = [{transform_indices = @transform_0, window_bounds = array<i64: 128, 128>}, {pipeline_mode = #tpu.pipeline_mode<synchronous>, transform_indices = @transform_1, window_bounds = array<i64: 128, 128>}, {pipeline_mode = #tpu.pipeline_mode<synchronous>, transform_indices = @transform_2, window_bounds = array<i64: 1, 128>}, {pipeline_mode = #tpu.pipeline_mode<synchronous>, transform_indices = @transform_3, window_bounds = array<i64: 128, 128>}, {pipeline_mode = #tpu.pipeline_mode<synchronous>, transform_indices = @transform_4, window_bounds = array<i64: 1, 128>}, {pipeline_mode = #tpu.pipeline_mode<synchronous>, transform_indices = @transform_5, window_bounds = array<i64: 128, 128>}, {pipeline_mode = #tpu.pipeline_mode<synchronous>, transform_indices = @transform_6, window_bounds = array<i64: 1, 128>}, {pipeline_mode = #tpu.pipeline_mode<synchronous>, transform_indices = @transform_7, window_bounds = array<i64: 128, 128>}, {pipeline_mode = #tpu.pipeline_mode<synchronous>, transform_indices = @transform_8, window_bounds = array<i64: 1, 128>}, {transform_indices = @transform_9, window_bounds = array<i64: 128, 128>}]} {
    %c0 = arith.constant 0 : index
    %c0_0 = arith.constant 0 : index
    %0 = vector.load %arg1[%c0, %c0_0] : memref<128x128xbf16, #tpu.memory_space<vmem>>, vector<128x128xbf16>
    %c0_1 = arith.constant 0 : index
    %c0_2 = arith.constant 0 : index
    %1 = vector.load %arg2[%c0_1, %c0_2] : memref<128x128xbf16, #tpu.memory_space<vmem>>, vector<128x128xbf16>
    %cst = arith.constant dense<0.000000e+00> : vector<128x128xf32>
    %2 = tpu.matmul %0, %1, %cst {dimension_numbers = #tpu.dot_dimension_numbers<[1], [0], [0], [1], [0, 0, 1, 1], [], []>} : vector<128x128xbf16>, vector<128x128xbf16>, vector<128x128xf32> -> vector<128x128xf32>
    %c0_3 = arith.constant 0 : index
    %c0_4 = arith.constant 0 : index
    %3 = vector.load %arg3[%c0_3, %c0_4] : memref<1x128xf32, #tpu.memory_space<vmem>>, vector<1x128xf32>
    %4 = vector.broadcast %3 : vector<1x128xf32> to vector<128x128xf32>
    %5 = arith.addf %2, %4 : vector<128x128xf32>
    %cst_5 = arith.constant 0.000000e+00 : f32
    %6 = vector.broadcast %cst_5 : f32 to vector<128x128xf32>
    %7 = arith.maximumf %5, %6 : vector<128x128xf32>
    %8 = arith.truncf %7 : vector<128x128xf32> to vector<128x128xbf16>
    %c0_6 = arith.constant 0 : index
    %c0_7 = arith.constant 0 : index
    %9 = vector.load %arg4[%c0_6, %c0_7] : memref<128x128xbf16, #tpu.memory_space<vmem>>, vector<128x128xbf16>
    %cst_8 = arith.constant dense<0.000000e+00> : vector<128x128xf32>
    %10 = tpu.matmul %8, %9, %cst_8 {dimension_numbers = #tpu.dot_dimension_numbers<[1], [0], [0], [1], [0, 0, 1, 1], [], []>} : vector<128x128xbf16>, vector<128x128xbf16>, vector<128x128xf32> -> vector<128x128xf32>
    %c0_9 = arith.constant 0 : index
    %c0_10 = arith.constant 0 : index
    %11 = vector.load %arg5[%c0_9, %c0_10] : memref<1x128xf32, #tpu.memory_space<vmem>>, vector<1x128xf32>
    %12 = vector.broadcast %11 : vector<1x128xf32> to vector<128x128xf32>
    %13 = arith.addf %10, %12 : vector<128x128xf32>
    %cst_11 = arith.constant 0.000000e+00 : f32
    %14 = vector.broadcast %cst_11 : f32 to vector<128x128xf32>
    %15 = arith.maximumf %13, %14 : vector<128x128xf32>
    %16 = arith.truncf %15 : vector<128x128xf32> to vector<128x128xbf16>
    %c0_12 = arith.constant 0 : index
    %c0_13 = arith.constant 0 : index
    %17 = vector.load %arg6[%c0_12, %c0_13] : memref<128x128xbf16, #tpu.memory_space<vmem>>, vector<128x128xbf16>
    %cst_14 = arith.constant dense<0.000000e+00> : vector<128x128xf32>
    %18 = tpu.matmul %16, %17, %cst_14 {dimension_numbers = #tpu.dot_dimension_numbers<[1], [0], [0], [1], [0, 0, 1, 1], [], []>} : vector<128x128xbf16>, vector<128x128xbf16>, vector<128x128xf32> -> vector<128x128xf32>
    %c0_15 = arith.constant 0 : index
    %c0_16 = arith.constant 0 : index
    %19 = vector.load %arg7[%c0_15, %c0_16] : memref<1x128xf32, #tpu.memory_space<vmem>>, vector<1x128xf32>
    %20 = vector.broadcast %19 : vector<1x128xf32> to vector<128x128xf32>
    %21 = arith.addf %18, %20 : vector<128x128xf32>
    %cst_17 = arith.constant 0.000000e+00 : f32
    %22 = vector.broadcast %cst_17 : f32 to vector<128x128xf32>
    %23 = arith.maximumf %21, %22 : vector<128x128xf32>
    %24 = arith.truncf %23 : vector<128x128xf32> to vector<128x128xbf16>
    %c0_18 = arith.constant 0 : index
    %c0_19 = arith.constant 0 : index
    %25 = vector.load %arg8[%c0_18, %c0_19] : memref<128x128xbf16, #tpu.memory_space<vmem>>, vector<128x128xbf16>
    %cst_20 = arith.constant dense<0.000000e+00> : vector<128x128xf32>
    %26 = tpu.matmul %24, %25, %cst_20 {dimension_numbers = #tpu.dot_dimension_numbers<[1], [0], [0], [1], [0, 0, 1, 1], [], []>} : vector<128x128xbf16>, vector<128x128xbf16>, vector<128x128xf32> -> vector<128x128xf32>
    %c0_21 = arith.constant 0 : index
    %c0_22 = arith.constant 0 : index
    %27 = vector.load %arg9[%c0_21, %c0_22] : memref<1x128xf32, #tpu.memory_space<vmem>>, vector<1x128xf32>
    %28 = vector.broadcast %27 : vector<1x128xf32> to vector<128x128xf32>
    %29 = arith.addf %26, %28 : vector<128x128xf32>
    %30 = arith.truncf %29 : vector<128x128xf32> to vector<128x128xbf16>
    %c0_23 = arith.constant 0 : index
    %c0_24 = arith.constant 0 : index
    %31 = vector.load %arg10[%c0_23, %c0_24] : memref<128x128xbf16, #tpu.memory_space<vmem>>, vector<128x128xbf16>
    tpu.vector_store %arg10[%c0_23, %c0_24], %30 {strides = array<i32>} : memref<128x128xbf16, #tpu.memory_space<vmem>>, vector<128x128xbf16>,
    return
  }
  func.func @transform_0(%arg0: i32) -> (i32, i32) {
    %c0_i32 = arith.constant 0 : i32
    %c0_i32_0 = arith.constant 0 : i32
    return %arg0, %c0_i32 : i32, i32
  }
  func.func @transform_1(%arg0: i32) -> (i32, i32) {
    %c0_i32 = arith.constant 0 : i32
    %c0_i32_0 = arith.constant 0 : i32
    %c0_i32_1 = arith.constant 0 : i32
    return %c0_i32, %c0_i32_0 : i32, i32
  }
  func.func @transform_2(%arg0: i32) -> (i32, i32) {
    %c0_i32 = arith.constant 0 : i32
    %c0_i32_0 = arith.constant 0 : i32
    %c0_i32_1 = arith.constant 0 : i32
    return %c0_i32, %c0_i32_0 : i32, i32
  }
  func.func @transform_3(%arg0: i32) -> (i32, i32) {
    %c0_i32 = arith.constant 0 : i32
    %c0_i32_0 = arith.constant 0 : i32
    %c0_i32_1 = arith.constant 0 : i32
    return %c0_i32, %c0_i32_0 : i32, i32
  }
  func.func @transform_4(%arg0: i32) -> (i32, i32) {
    %c0_i32 = arith.constant 0 : i32
    %c0_i32_0 = arith.constant 0 : i32
    %c0_i32_1 = arith.constant 0 : i32
    return %c0_i32, %c0_i32_0 : i32, i32
  }
  func.func @transform_5(%arg0: i32) -> (i32, i32) {
    %c0_i32 = arith.constant 0 : i32
    %c0_i32_0 = arith.constant 0 : i32
    %c0_i32_1 = arith.constant 0 : i32
    return %c0_i32, %c0_i32_0 : i32, i32
  }
  func.func @transform_6(%arg0: i32) -> (i32, i32) {
    %c0_i32 = arith.constant 0 : i32
    %c0_i32_0 = arith.constant 0 : i32
    %c0_i32_1 = arith.constant 0 : i32
    return %c0_i32, %c0_i32_0 : i32, i32
  }
  func.func @transform_7(%arg0: i32) -> (i32, i32) {
    %c0_i32 = arith.constant 0 : i32
    %c0_i32_0 = arith.constant 0 : i32
    %c0_i32_1 = arith.constant 0 : i32
    return %c0_i32, %c0_i32_0 : i32, i32
  }
  func.func @transform_8(%arg0: i32) -> (i32, i32) {
    %c0_i32 = arith.constant 0 : i32
    %c0_i32_0 = arith.constant 0 : i32
    %c0_i32_1 = arith.constant 0 : i32
    return %c0_i32, %c0_i32_0 : i32, i32
  }
  func.func @transform_9(%arg0: i32) -> (i32, i32) {
    %c0_i32 = arith.constant 0 : i32
    %c0_i32_0 = arith.constant 0 : i32
    return %arg0, %c0_i32 : i32, i32
  }
}

</mosaic_0001>

<bundles_post_ra>
// kernel: net_forward.1
= control target key start
LH: loop header
LB: loop body
LE: loop exit
PB: predicated region body
PF: predicated region fallthrough
CT: control target
= control target key end

     0   :  { %14 = vsyncpa [#allocation3], 0  ;;  %s1589_s0 = inlined_call_operand.vmem [shape: bf16[128,128], index: 0, kind: input, shape index: {}]   ;;  %s1590_s1 = inlined_call_operand.vmem [shape: bf16[128,128], index: 1, kind: input, shape index: {}]   ;;  %s1591_s2 = inlined_call_operand.vmem [shape: f32[1,128], index: 2, kind: input, shape index: {}]   ;;  %s1592_s3 = inlined_call_operand.hbm [shape: bf16[128,128], index: 3, kind: input, shape index: {}]   ;;  %s1593_s4 = inlined_call_operand.vmem [shape: f32[1,128], index: 4, kind: input, shape index: {}]   ;;  %s1594_s5 = inlined_call_operand.hbm [shape: bf16[128,128], index: 5, kind: input, shape index: {}]   ;;  %s1595_s6 = inlined_call_operand.vmem [shape: f32[1,128], index: 6, kind: input, shape index: {}]   ;;  %s1596_s7 = inlined_call_operand.hbm [shape: bf16[128,128], index: 7, kind: input, shape index: {}]   ;;  %s1597_s8 = inlined_call_operand.vmem [shape: f32[1,128], index: 8, kind: input, shape index: {}]   ;;  %s1598_s9 = inlined_call_operand.vmem [shape: bf16[128,128], index: 9, kind: output, shape index: {}]  }
   0x1   :  { %15 = vsyncpa [#allocation5], 0  ;;  %s1398_s30 = smov [#allocation4]   ;;  %s1399_s11 = smov [#allocation2]  }
   0x2   :  { %s41_s10 = sshll.u32 %s1398_s30, 4  ;;  %s27_s12 = sshll.u32 %s1399_s11, 4  ;;  %s42_s10 = int_to_ptr.vmem [resolvable:$true] %s41_s10  ;;  %s1453_s12 = int_to_ptr.vmem [resolvable:$true] %s27_s12 }
   0x3   :  { %s1328_s15 = scalar_lea.hbm %s1594_s5, 1024 }
   0x4   :  { %p1329_p0 = scmp.ne.s32.totalorder %s1594_s5, %s1328_s15  ;;  %p1332_p1 = scmp.lt.u32.totalorder %s1328_s15, %s1594_s5 }
   0x6   :  { %p1334_p2 = pnand %p1332_p1, %p1329_p0 }
   0x8   :  { %1337 = shalt.err (!%p1334_p2)
}
   0x9   :  { %s1338_s20 = scalar_lea.vmem %s42_s10, 1024  ;;  %p1343_p4 = scmp.lt.s32.totalorder %s42_s10, %s42_s10 }
   0xa   :  { %p1339_p3 = scmp.ne.s32.totalorder %s42_s10, %s1338_s20  ;;  %p1344_p5 = scmp.lt.s32.totalorder %s1338_s20, %s1338_s20 }
   0xc   :  { %p1345_p6 = por %p1344_p5, %p1343_p4 }
   0xe   :  { %p1346_p7 = pnand %p1345_p6, %p1339_p3 }
  0x10   :  { %1349 = shalt.err (!%p1346_p7)
}
  0x11   :  { %s1400_s21 = smov 64   ;;  %s1401_s22 = smov 4  }
  0x12   :  { %47 = dma.hbm_to_vmem [thread:$0]  %s1594_s5, 1024, %s42_s10, [#allocation5], %s1400_s21, %s1400_s21, %s1401_s22  }
  0x13   :  { %s1350_s27 = scalar_lea.hbm %s1592_s3, 1024 }
  0x14   :  { %p1351_p8 = scmp.ne.s32.totalorder %s1592_s3, %s1350_s27  ;;  %p1354_p9 = scmp.lt.u32.totalorder %s1350_s27, %s1592_s3 }
  0x16   :  { %p1356_p10 = pnand %p1354_p9, %p1351_p8 }
  0x18   :  { %1359 = shalt.err (!%p1356_p10)
}
  0x19   :  { %s1360_s13 = scalar_lea.vmem %s1453_s12, 1024  ;;  %p1365_p12 = scmp.lt.s32.totalorder %s1453_s12, %s1453_s12 }
  0x1a   :  { %p1361_p11 = scmp.ne.s32.totalorder %s1453_s12, %s1360_s13  ;;  %p1366_p13 = scmp.lt.s32.totalorder %s1360_s13, %s1360_s13 }
  0x1c   :  { %p1367_p0 = por %p1366_p13, %p1365_p12 }
  0x1e   :  { %p1368_p1 = pnand %p1367_p0, %p1361_p11 }
  0x20   :  { %1371 = shalt.err (!%p1368_p1)
}
  0x21   :  { %33 = dma.hbm_to_vmem [thread:$0]  %s1592_s3, 1024, %s1453_s12, [#allocation3], %s1400_s21, %s1400_s21, %s1401_s22  }
  0x22   :  { %s1402_s14 = smov [#allocation6]   ;;  %s1372_s18 = scalar_lea.hbm %s1596_s7, 1024 }
  0x23   :  { %s55_s15 = sshll.u32 %s1402_s14, 4  ;;  %p1373_p2 = scmp.ne.s32.totalorder %s1596_s7, %s1372_s18  ;;  %s56_s15 = int_to_ptr.vmem [resolvable:$true] %s55_s15 }
  0x24   :  { %p1376_p3 = scmp.lt.u32.totalorder %s1372_s18, %s1596_s7 }
  0x26   :  { %p1378_p4 = pnand %p1376_p3, %p1373_p2 }
  0x28   :  { %1381 = shalt.err (!%p1378_p4)
}
  0x29   :  { %s1382_s25 = scalar_lea.vmem %s56_s15, 1024  ;;  %p1387_p6 = scmp.lt.s32.totalorder %s56_s15, %s56_s15 }
  0x2a   :  { %p1383_p5 = scmp.ne.s32.totalorder %s56_s15, %s1382_s25  ;;  %p1388_p7 = scmp.lt.s32.totalorder %s1382_s25, %s1382_s25 }
  0x2c   :  { %p1389_p8 = por %p1388_p7, %p1387_p6 }
  0x2e   :  { %p1390_p9 = pnand %p1389_p8, %p1383_p5 }
  0x30   :  { %1393 = shalt.err (!%p1390_p9)
}
  0x31   :  { %61 = dma.hbm_to_vmem [thread:$0]  %s1596_s7, 1024, %s56_s15, [#allocation5], %s1400_s21, %s1400_s21, %s1401_s22  }
  0x32   :  { %1394 = dma.done.wait [#allocation3], 1024  }
  0x33   :  { %1395 = vsyncadd [#allocation3], 4294966272 }
  0x34   :  { %1396 = dma.done.wait [#allocation5], 2048  }
  0x35   :  { %1397 = vsyncadd [#allocation5], 4294965248  ;;  %v1288_v0 = vld [vmem:[%s1590_s1] sm:$0xff]   ;;  %v1289_v1 = vld [vmem:[%s1590_s1 + $0x8] sm:$0xff]  }
  0x36   :  { %1155 = vmatprep.subr.bf16.mxu0 %v1288_v0  ;;  %v1290_v2 = vld [vmem:[%s1590_s1 + $0x10] sm:$0xff]   ;;  %v1291_v3 = vld [vmem:[%s1590_s1 + $0x18] sm:$0xff]   ;;  %v1296_v4 = vld [vmem:[%s1589_s0] sm:$0xff]  }
  0x37   :  { %1156 = vmatpush3.bf16.msra.mxu0 %v1288_v0  ;;  %1171 = vmatprep.mubr.bf16.mxu0 %v1296_v4  ;;  %v1292_v5 = vld [vmem:[%s1590_s1 + $0x20] sm:$0xff]   ;;  %v1293_v6 = vld [vmem:[%s1590_s1 + $0x28] sm:$0xff]   ;;  %v1294_v9 = vld [vmem:[%s1590_s1 + $0x30] sm:$0xff]  }
  0x38   :  { %1157 = vmatprep.subr.bf16.mxu0 %v1289_v1  ;;  %v1304_v7 = vld [vmem:[#allocation2] sm:$0xff]   ;;  %v1305_v8 = vld [vmem:[#allocation2 + $0x8] sm:$0xff]   ;;  %v1306_v10 = vld [vmem:[#allocation2 + $0x10] sm:$0xff]  }
  0x39   :  { %1187 = vmatprep.subr.bf16.mxu1 %v1304_v7  ;;  %v1295_v11 = vld [vmem:[%s1590_s1 + $0x38] sm:$0xff]   ;;  %v1308_v13 = vld [vmem:[#allocation2 + $0x20] sm:$0xff]   ;;  %v1297_v14 = vld [vmem:[%s1589_s0 + $0x8] sm:$0xff]  }
  0x3a   :  { %1188 = vmatpush3.bf16.msra.mxu1 %v1304_v7  ;;  %v1307_v12 = vld [vmem:[#allocation2 + $0x18] sm:$0xff]   ;;  %v1298_v15 = vld [vmem:[%s1589_s0 + $0x10] sm:$0xff]   ;;  %v1309_v16 = vld [vmem:[#allocation2 + $0x28] sm:$0xff]  }
  0x3b   :  { %1158 = vmatpush3.bf16.msra.mxu0 %v1289_v1  ;;  %1189 = vmatprep.subr.bf16.mxu1 %v1305_v8  ;;  %v1299_v17 = vld [vmem:[%s1589_s0 + $0x18] sm:$0xff]   ;;  %v1300_v18 = vld [vmem:[%s1589_s0 + $0x20] sm:$0xff]   ;;  %v1301_v19 = vld [vmem:[%s1589_s0 + $0x28] sm:$0xff]  }
  0x3c   :  { %1159 = vmatprep.subr.bf16.mxu0 %v1290_v2  ;;  %v1302_v20 = vld [vmem:[%s1589_s0 + $0x30] sm:$0xff]   ;;  %v1303_v21 = vld [vmem:[%s1589_s0 + $0x38] sm:$0xff]   ;;  %v1312_v24 = vld [vmem:[#allocation4] sm:$0xff]  }
  0x3d   :  { %v1310_v22 = vld [vmem:[#allocation2 + $0x30] sm:$0xff]   ;;  %v1311_v23 = vld [vmem:[#allocation2 + $0x38] sm:$0xff]   ;;  %v1313_v25 = vld [vmem:[#allocation4 + $0x8] sm:$0xff]  }
  0x3e   :  { %1190 = vmatpush3.bf16.msra.mxu1 %v1305_v8  ;;  %v1314_v26 = vld [vmem:[#allocation4 + $0x10] sm:$0xff]   ;;  %v1315_v27 = vld [vmem:[#allocation4 + $0x18] sm:$0xff]   ;;  %v1316_v28 = vld [vmem:[#allocation4 + $0x20] sm:$0xff]  }
  0x3f   :  { %1160 = vmatpush3.bf16.msra.mxu0 %v1290_v2  ;;  %1191 = vmatprep.subr.bf16.mxu1 %v1306_v10  ;;  %v1317_v29 = vld [vmem:[#allocation4 + $0x28] sm:$0xff]   ;;  %v968_v30 = vld [vmem:[%s1591_s2] ss:$0 sm:$0xff] }
  0x40   :  { %1161 = vmatprep.subr.bf16.mxu0 %v1291_v3 }
  0x42   :  { %1192 = vmatpush3.bf16.msra.mxu1 %v1306_v10 }
  0x43   :  { %1162 = vmatpush3.bf16.msra.mxu0 %v1291_v3  ;;  %1193 = vmatprep.subr.bf16.mxu1 %v1307_v12 }
  0x44   :  { %1163 = vmatprep.subr.bf16.mxu0 %v1292_v5 }
  0x46   :  { %1194 = vmatpush3.bf16.msra.mxu1 %v1307_v12 }
  0x47   :  { %1164 = vmatpush3.bf16.msra.mxu0 %v1292_v5  ;;  %1195 = vmatprep.subr.bf16.mxu1 %v1308_v13 }
  0x48   :  { %1165 = vmatprep.subr.bf16.mxu0 %v1293_v6 }
  0x4a   :  { %1196 = vmatpush3.bf16.msra.mxu1 %v1308_v13 }
  0x4b   :  { %1166 = vmatpush3.bf16.msra.mxu0 %v1293_v6  ;;  %1197 = vmatprep.subr.bf16.mxu1 %v1309_v16 }
  0x4c   :  { %1167 = vmatprep.subr.bf16.mxu0 %v1294_v9 }
  0x4e   :  { %1198 = vmatpush3.bf16.msra.mxu1 %v1309_v16 }
  0x4f   :  { %1168 = vmatpush3.bf16.msra.mxu0 %v1294_v9  ;;  %1199 = vmatprep.subr.bf16.mxu1 %v1310_v22 }
  0x50   :  { %1169 = vmatprep.subr.bf16.mxu0 %v1295_v11 }
  0x52   :  { %1200 = vmatpush3.bf16.msra.mxu1 %v1310_v22 }
  0x53   :  { %1170 = vmatpush3.bf16.msra.mxu0 %v1295_v11  ;;  %1201 = vmatprep.subr.bf16.mxu1 %v1311_v23 }
  0x54   :  { %1219 = vmatprep.subr.bf16.mxu0 %v1312_v24 }
  0x56   :  { %1172 = vmatmul.mubr.bf16.vlgmr.msra.gmra.mrb[0].mxu0 %v1297_v14  ;;  %1202 = vmatpush3.bf16.msra.mxu1 %v1311_v23  ;;  %v1318_v23 = vld [vmem:[#allocation4 + $0x30] sm:$0xff]  }
  0x57   :  { %1175 = vmatprep.mubr.bf16.mxu0 %v1298_v15  ;;  %1220 = vmatpush3.bf16.msra.mxu0 %v1312_v24  ;;  %v1319_v24 = vld [vmem:[#allocation4 + $0x38] sm:$0xff]  }
  0x58   :  { %1221 = vmatprep.subr.bf16.mxu0 %v1313_v25 }
  0x5b   :  { %1222 = vmatpush3.bf16.msra.mxu0 %v1313_v25  ;;  %v1320_v25 = vld [vmem:[#allocation6] sm:$0xff]  }
  0x5c   :  { %1223 = vmatprep.subr.bf16.mxu0 %v1314_v26  ;;  %1251 = vmatprep.subr.bf16.mxu1 %v1320_v25 }
  0x5e   :  { %1176 = vmatmul.mubr.bf16.gmra.mrb[4].mxu0 %v1299_v17 }
  0x5f   :  { %1179 = vmatprep.mubr.bf16.mxu0 %v1300_v18  ;;  %1224 = vmatpush3.bf16.msra.mxu0 %v1314_v26  ;;  %v1321_v26 = vld [vmem:[#allocation6 + $0x8] sm:$0xff]  }
  0x60   :  { %1225 = vmatprep.subr.bf16.mxu0 %v1315_v27 }
  0x63   :  { %1226 = vmatpush3.bf16.msra.mxu0 %v1315_v27  ;;  %v1322_v27 = vld [vmem:[#allocation6 + $0x10] sm:$0xff]  }
  0x64   :  { %1227 = vmatprep.subr.bf16.mxu0 %v1316_v28 }
  0x66   :  { %1180 = vmatmul.mubr.bf16.gmra.mrb[8].mxu0 %v1301_v19 }
  0x67   :  { %1183 = vmatprep.mubr.bf16.mxu0 %v1302_v20  ;;  %1228 = vmatpush3.bf16.msra.mxu0 %v1316_v28  ;;  %v1323_v28 = vld [vmem:[#allocation6 + $0x18] sm:$0xff]  }
  0x68   :  { %1229 = vmatprep.subr.bf16.mxu0 %v1317_v29 }
  0x6b   :  { %1230 = vmatpush3.bf16.msra.mxu0 %v1317_v29  ;;  %v1324_v29 = vld [vmem:[#allocation6 + $0x20] sm:$0xff]  }
  0x6c   :  { %1231 = vmatprep.subr.bf16.mxu0 %v1318_v23 }
  0x6e   :  { %1184 = vmatmul.mubr.bf16.gmra.mrb[12].mxu0 %v1303_v21 }
  0x6f   :  { %1232 = vmatpush3.bf16.msra.mxu0 %v1318_v23 }
  0x70   :  { %1233 = vmatprep.subr.bf16.mxu0 %v1319_v24 }
  0x73   :  { %1234 = vmatpush3.bf16.msra.mxu0 %v1319_v24  ;;  %v1326_v24 = vld [vmem:[#allocation6 + $0x30] sm:$0xff]  }
 0x129   :  { %v1173_v31 = vpop.f32.mrb[0].mxu0 }
 0x12a   :  { %v252_v32 = vadd.f32 %v1173_v31, %v968_v30  ;;  %v243_v33 = vpop.f32.mrb[1].mxu0  ;;  %v985_v31 = vld [vmem:[%s1593_s4] ss:$0 sm:$0xff] }
 0x12b   :  { %v244_v34 = vadd.f32 %v968_v30, %v243_v33  ;;  %v1174_v35 = vpop.f32.mrb[2].mxu0 }
 0x12c   :  { %v255_v36 = vadd.f32 %v1174_v35, %v968_v30  ;;  %v246_v37 = vpop.f32.mrb[3].mxu0  ;;  %v308_v39 = vmax.f32 %v252_v32, 0.0 }
 0x12d   :  { %v247_v38 = vadd.f32 %v968_v30, %v246_v37  ;;  %v306_v41 = vmax.f32 %v244_v34, 0.0 }
 0x12e   :  { %v309_v40 = vmax.f32 %v255_v36, 0.0 }
 0x12f   :  { %v307_v42 = vmax.f32 %v247_v38, 0.0 }
 0x130   :  { %v323_v43 = vpack.c.bf16 %v309_v40, %v308_v39 }
 0x131   :  { %v1177_v44 = vpop.f32.mrb[4].mxu0  ;;  %v322_v45 = vpack.c.bf16 %v307_v42, %v306_v41 }
 0x132   :  { %v268_v46 = vadd.f32 %v1177_v44, %v968_v30  ;;  %v259_v47 = vpop.f32.mrb[5].mxu0 }
 0x133   :  { %v260_v48 = vadd.f32 %v968_v30, %v259_v47  ;;  %v1178_v49 = vpop.f32.mrb[6].mxu0  ;;  %1203 = vmatprep.mubr.bf16.mxu1 %v322_v45 }
 0x134   :  { %v271_v50 = vadd.f32 %v1178_v49, %v968_v30  ;;  %v262_v51 = vpop.f32.mrb[7].mxu0  ;;  %1204 = vmatmul.mubr.bf16.vlgmr.msra.gmra.mrb[0].mxu1 %v323_v43  ;;  %v312_v53 = vmax.f32 %v268_v46, 0.0 }
 0x135   :  { %v263_v52 = vadd.f32 %v968_v30, %v262_v51  ;;  %v310_v55 = vmax.f32 %v260_v48, 0.0  ;;  %1252 = vmatpush3.bf16.msra.mxu1 %v1320_v25  ;;  %v1327_v25 = vld [vmem:[#allocation6 + $0x38] sm:$0xff]  }
 0x136   :  { %v313_v54 = vmax.f32 %v271_v50, 0.0  ;;  %1253 = vmatprep.subr.bf16.mxu1 %v1321_v26 }
 0x137   :  { %v311_v56 = vmax.f32 %v263_v52, 0.0 }
 0x138   :  { %v325_v57 = vpack.c.bf16 %v313_v54, %v312_v53 }
 0x139   :  { %v324_v58 = vpack.c.bf16 %v311_v56, %v310_v55  ;;  %v1181_v59 = vpop.f32.mrb[8].mxu0  ;;  %1254 = vmatpush3.bf16.msra.mxu1 %v1321_v26  ;;  %v994_v26 = vld [vmem:[%s1595_s6] ss:$0 sm:$0xff] }
 0x13a   :  { %v284_v60 = vadd.f32 %v1181_v59, %v968_v30  ;;  %v275_v61 = vpop.f32.mrb[9].mxu0  ;;  %1255 = vmatprep.subr.bf16.mxu1 %v1322_v27 }
 0x13b   :  { %v276_v62 = vadd.f32 %v968_v30, %v275_v61  ;;  %v1182_v63 = vpop.f32.mrb[10].mxu0  ;;  %1207 = vmatprep.mubr.bf16.mxu1 %v324_v58 }
 0x13c   :  { %v287_v0 = vadd.f32 %v1182_v63, %v968_v30  ;;  %v278_v1 = vpop.f32.mrb[11].mxu0  ;;  %1208 = vmatmul.mubr.bf16.gmra.mrb[4].mxu1 %v325_v57  ;;  %v316_v3 = vmax.f32 %v284_v60, 0.0 }
 0x13d   :  { %v279_v2 = vadd.f32 %v968_v30, %v278_v1  ;;  %v314_v5 = vmax.f32 %v276_v62, 0.0  ;;  %1256 = vmatpush3.bf16.msra.mxu1 %v1322_v27 }
 0x13e   :  { %v317_v4 = vmax.f32 %v287_v0, 0.0  ;;  %1257 = vmatprep.subr.bf16.mxu1 %v1323_v28 }
 0x13f   :  { %v315_v6 = vmax.f32 %v279_v2, 0.0 }
 0x140   :  { %v327_v7 = vpack.c.bf16 %v317_v4, %v316_v3 }
 0x141   :  { %v326_v8 = vpack.c.bf16 %v315_v6, %v314_v5  ;;  %v1185_v9 = vpop.f32.mrb[12].mxu0  ;;  %1258 = vmatpush3.bf16.msra.mxu1 %v1323_v28 }
 0x142   :  { %v300_v10 = vadd.f32 %v1185_v9, %v968_v30  ;;  %v291_v11 = vpop.f32.mrb[13].mxu0  ;;  %1259 = vmatprep.subr.bf16.mxu1 %v1324_v29 }
 0x143   :  { %v292_v12 = vadd.f32 %v968_v30, %v291_v11  ;;  %v1186_v13 = vpop.f32.mrb[14].mxu0  ;;  %1211 = vmatprep.mubr.bf16.mxu1 %v326_v8 }
 0x144   :  { %v303_v14 = vadd.f32 %v1186_v13, %v968_v30  ;;  %v294_v15 = vpop.f32.mrb[15].mxu0  ;;  %1212 = vmatmul.mubr.bf16.gmra.mrb[8].mxu1 %v327_v7  ;;  %v320_v17 = vmax.f32 %v300_v10, 0.0 }
 0x145   :  { %v295_v16 = vadd.f32 %v968_v30, %v294_v15  ;;  %v318_v19 = vmax.f32 %v292_v12, 0.0  ;;  %v1325_v30 = vld [vmem:[#allocation6 + $0x28] sm:$0xff]   ;;  %1260 = vmatpush3.bf16.msra.mxu1 %v1324_v29 }
 0x146   :  { %v321_v18 = vmax.f32 %v303_v14, 0.0  ;;  %1261 = vmatprep.subr.bf16.mxu1 %v1325_v30 }
 0x147   :  { %v319_v20 = vmax.f32 %v295_v16, 0.0 }
 0x148   :  { %v329_v21 = vpack.c.bf16 %v321_v18, %v320_v17 }
 0x149   :  { %v328_v22 = vpack.c.bf16 %v319_v20, %v318_v19  ;;  %1262 = vmatpush3.bf16.msra.mxu1 %v1325_v30 }
 0x14a   :  { %1263 = vmatprep.subr.bf16.mxu1 %v1326_v24 }
 0x14b   :  { %1215 = vmatprep.mubr.bf16.mxu1 %v328_v22 }
 0x14c   :  { %1216 = vmatmul.mubr.bf16.gmra.mrb[12].mxu1 %v329_v21 }
 0x14d   :  { %1264 = vmatpush3.bf16.msra.mxu1 %v1326_v24 }
 0x14e   :  { %1265 = vmatprep.subr.bf16.mxu1 %v1327_v25 }
 0x151   :  { %1266 = vmatpush3.bf16.msra.mxu1 %v1327_v25 }
 0x207   :  { %v1205_v32 = vpop.f32.mrb[0].mxu1 }
 0x208   :  { %v444_v33 = vadd.f32 %v1205_v32, %v985_v31  ;;  %v435_v34 = vpop.f32.mrb[1].mxu1 }
 0x209   :  { %v436_v35 = vadd.f32 %v985_v31, %v435_v34  ;;  %v1206_v36 = vpop.f32.mrb[2].mxu1 }
 0x20a   :  { %v447_v37 = vadd.f32 %v1206_v36, %v985_v31  ;;  %v438_v38 = vpop.f32.mrb[3].mxu1  ;;  %v500_v40 = vmax.f32 %v444_v33, 0.0 }
 0x20b   :  { %v439_v39 = vadd.f32 %v985_v31, %v438_v38  ;;  %v498_v42 = vmax.f32 %v436_v35, 0.0 }
 0x20c   :  { %v501_v41 = vmax.f32 %v447_v37, 0.0 }
 0x20d   :  { %v499_v43 = vmax.f32 %v439_v39, 0.0 }
 0x20e   :  { %v515_v44 = vpack.c.bf16 %v501_v41, %v500_v40 }
 0x20f   :  { %v514_v45 = vpack.c.bf16 %v499_v43, %v498_v42  ;;  %v1209_v46 = vpop.f32.mrb[4].mxu1 }
 0x210   :  { %v460_v47 = vadd.f32 %v1209_v46, %v985_v31  ;;  %v451_v48 = vpop.f32.mrb[5].mxu1 }
 0x211   :  { %v452_v49 = vadd.f32 %v985_v31, %v451_v48  ;;  %v1210_v50 = vpop.f32.mrb[6].mxu1  ;;  %1235 = vmatprep.mubr.bf16.mxu0 %v514_v45 }
 0x212   :  { %v463_v51 = vadd.f32 %v1210_v50, %v985_v31  ;;  %v454_v52 = vpop.f32.mrb[7].mxu1  ;;  %1236 = vmatmul.mubr.bf16.vlgmr.msra.gmra.mrb[16].mxu0 %v515_v44  ;;  %v504_v54 = vmax.f32 %v460_v47, 0.0 }
 0x213   :  { %v455_v53 = vadd.f32 %v985_v31, %v454_v52  ;;  %v502_v56 = vmax.f32 %v452_v49, 0.0 }
 0x214   :  { %v505_v55 = vmax.f32 %v463_v51, 0.0 }
 0x215   :  { %v503_v57 = vmax.f32 %v455_v53, 0.0 }
 0x216   :  { %v517_v58 = vpack.c.bf16 %v505_v55, %v504_v54 }
 0x217   :  { %v516_v59 = vpack.c.bf16 %v503_v57, %v502_v56  ;;  %v1213_v60 = vpop.f32.mrb[8].mxu1 }
 0x218   :  { %v476_v61 = vadd.f32 %v1213_v60, %v985_v31  ;;  %v467_v62 = vpop.f32.mrb[9].mxu1 }
 0x219   :  { %v468_v63 = vadd.f32 %v985_v31, %v467_v62  ;;  %v1214_v0 = vpop.f32.mrb[10].mxu1  ;;  %1239 = vmatprep.mubr.bf16.mxu0 %v516_v59 }
 0x21a   :  { %v479_v1 = vadd.f32 %v1214_v0, %v985_v31  ;;  %v470_v2 = vpop.f32.mrb[11].mxu1  ;;  %1240 = vmatmul.mubr.bf16.gmra.mrb[20].mxu0 %v517_v58  ;;  %v508_v4 = vmax.f32 %v476_v61, 0.0 }
 0x21b   :  { %v471_v3 = vadd.f32 %v985_v31, %v470_v2  ;;  %v506_v6 = vmax.f32 %v468_v63, 0.0 }
 0x21c   :  { %v509_v5 = vmax.f32 %v479_v1, 0.0 }
 0x21d   :  { %v507_v7 = vmax.f32 %v471_v3, 0.0 }
 0x21e   :  { %v519_v8 = vpack.c.bf16 %v509_v5, %v508_v4 }
 0x21f   :  { %v518_v9 = vpack.c.bf16 %v507_v7, %v506_v6  ;;  %v1217_v10 = vpop.f32.mrb[12].mxu1 }
 0x220   :  { %v492_v11 = vadd.f32 %v1217_v10, %v985_v31  ;;  %v483_v12 = vpop.f32.mrb[13].mxu1 }
 0x221   :  { %v484_v13 = vadd.f32 %v985_v31, %v483_v12  ;;  %v1218_v14 = vpop.f32.mrb[14].mxu1  ;;  %1243 = vmatprep.mubr.bf16.mxu0 %v518_v9 }
 0x222   :  { %v495_v15 = vadd.f32 %v1218_v14, %v985_v31  ;;  %v486_v16 = vpop.f32.mrb[15].mxu1  ;;  %1244 = vmatmul.mubr.bf16.gmra.mrb[24].mxu0 %v519_v8  ;;  %v512_v18 = vmax.f32 %v492_v11, 0.0 }
 0x223   :  { %v487_v17 = vadd.f32 %v985_v31, %v486_v16  ;;  %v510_v20 = vmax.f32 %v484_v13, 0.0 }
 0x224   :  { %v513_v19 = vmax.f32 %v495_v15, 0.0 }
 0x225   :  { %v511_v21 = vmax.f32 %v487_v17, 0.0 }
 0x226   :  { %v521_v22 = vpack.c.bf16 %v513_v19, %v512_v18 }
 0x227   :  { %v520_v23 = vpack.c.bf16 %v511_v21, %v510_v20  ;;  %v1003_v20 = vld [vmem:[%s1597_s8] ss:$0 sm:$0xff] }
 0x229   :  { %1247 = vmatprep.mubr.bf16.mxu0 %v520_v23 }
 0x22a   :  { %1248 = vmatmul.mubr.bf16.gmra.mrb[28].mxu0 %v521_v22 }
 0x2e5   :  { %v1237_v27 = vpop.f32.mrb[16].mxu0 }
 0x2e6   :  { %v636_v28 = vadd.f32 %v1237_v27, %v994_v26  ;;  %v627_v29 = vpop.f32.mrb[17].mxu0 }
 0x2e7   :  { %v628_v30 = vadd.f32 %v994_v26, %v627_v29  ;;  %v1238_v31 = vpop.f32.mrb[18].mxu0 }
 0x2e8   :  { %v639_v32 = vadd.f32 %v1238_v31, %v994_v26  ;;  %v630_v33 = vpop.f32.mrb[19].mxu0  ;;  %v692_v35 = vmax.f32 %v636_v28, 0.0 }
 0x2e9   :  { %v631_v34 = vadd.f32 %v994_v26, %v630_v33  ;;  %v690_v37 = vmax.f32 %v628_v30, 0.0 }
 0x2ea   :  { %v693_v36 = vmax.f32 %v639_v32, 0.0 }
 0x2eb   :  { %v691_v38 = vmax.f32 %v631_v34, 0.0 }
 0x2ec   :  { %v707_v39 = vpack.c.bf16 %v693_v36, %v692_v35 }
 0x2ed   :  { %v706_v40 = vpack.c.bf16 %v691_v38, %v690_v37  ;;  %v1241_v41 = vpop.f32.mrb[20].mxu0 }
 0x2ee   :  { %v652_v42 = vadd.f32 %v1241_v41, %v994_v26  ;;  %v643_v43 = vpop.f32.mrb[21].mxu0 }
 0x2ef   :  { %v644_v44 = vadd.f32 %v994_v26, %v643_v43  ;;  %v1242_v45 = vpop.f32.mrb[22].mxu0  ;;  %1267 = vmatprep.mubr.bf16.mxu1 %v706_v40 }
 0x2f0   :  { %v655_v46 = vadd.f32 %v1242_v45, %v994_v26  ;;  %v646_v47 = vpop.f32.mrb[23].mxu0  ;;  %1268 = vmatmul.mubr.bf16.vlgmr.msra.gmra.mrb[16].mxu1 %v707_v39  ;;  %v696_v49 = vmax.f32 %v652_v42, 0.0 }
 0x2f1   :  { %v647_v48 = vadd.f32 %v994_v26, %v646_v47  ;;  %v694_v51 = vmax.f32 %v644_v44, 0.0 }
 0x2f2   :  { %v697_v50 = vmax.f32 %v655_v46, 0.0 }
 0x2f3   :  { %v695_v52 = vmax.f32 %v647_v48, 0.0 }
 0x2f4   :  { %v709_v53 = vpack.c.bf16 %v697_v50, %v696_v49 }
 0x2f5   :  { %v708_v54 = vpack.c.bf16 %v695_v52, %v694_v51  ;;  %v1245_v55 = vpop.f32.mrb[24].mxu0 }
 0x2f6   :  { %v668_v56 = vadd.f32 %v1245_v55, %v994_v26  ;;  %v659_v57 = vpop.f32.mrb[25].mxu0 }
 0x2f7   :  { %v660_v58 = vadd.f32 %v994_v26, %v659_v57  ;;  %v1246_v59 = vpop.f32.mrb[26].mxu0  ;;  %1271 = vmatprep.mubr.bf16.mxu1 %v708_v54 }
 0x2f8   :  { %v671_v60 = vadd.f32 %v1246_v59, %v994_v26  ;;  %v662_v61 = vpop.f32.mrb[27].mxu0  ;;  %1272 = vmatmul.mubr.bf16.gmra.mrb[20].mxu1 %v709_v53  ;;  %v700_v63 = vmax.f32 %v668_v56, 0.0 }
 0x2f9   :  { %v663_v62 = vadd.f32 %v994_v26, %v662_v61  ;;  %v698_v1 = vmax.f32 %v660_v58, 0.0 }
 0x2fa   :  { %v701_v0 = vmax.f32 %v671_v60, 0.0 }
 0x2fb   :  { %v699_v2 = vmax.f32 %v663_v62, 0.0 }
 0x2fc   :  { %v711_v3 = vpack.c.bf16 %v701_v0, %v700_v63 }
 0x2fd   :  { %v710_v4 = vpack.c.bf16 %v699_v2, %v698_v1  ;;  %v1249_v5 = vpop.f32.mrb[28].mxu0 }
 0x2fe   :  { %v684_v6 = vadd.f32 %v1249_v5, %v994_v26  ;;  %v675_v7 = vpop.f32.mrb[29].mxu0 }
 0x2ff   :  { %v676_v8 = vadd.f32 %v994_v26, %v675_v7  ;;  %v1250_v9 = vpop.f32.mrb[30].mxu0  ;;  %1275 = vmatprep.mubr.bf16.mxu1 %v710_v4 }
 0x300   :  { %v687_v10 = vadd.f32 %v1250_v9, %v994_v26  ;;  %v678_v11 = vpop.f32.mrb[31].mxu0  ;;  %1276 = vmatmul.mubr.bf16.gmra.mrb[24].mxu1 %v711_v3  ;;  %v704_v13 = vmax.f32 %v684_v6, 0.0 }
 0x301   :  { %v679_v12 = vadd.f32 %v994_v26, %v678_v11  ;;  %v702_v15 = vmax.f32 %v676_v8, 0.0 }
 0x302   :  { %v705_v14 = vmax.f32 %v687_v10, 0.0 }
 0x303   :  { %v703_v16 = vmax.f32 %v679_v12, 0.0 }
 0x304   :  { %v713_v17 = vpack.c.bf16 %v705_v14, %v704_v13 }
 0x305   :  { %v712_v18 = vpack.c.bf16 %v703_v16, %v702_v15 }
 0x307   :  { %1279 = vmatprep.mubr.bf16.mxu1 %v712_v18 }
 0x308   :  { %1280 = vmatmul.mubr.bf16.gmra.mrb[28].mxu1 %v713_v17 }
 0x3c3   :  { %v1269_v19 = vpop.f32.mrb[16].mxu1 }
 0x3c4   :  { %v819_v21 = vpop.f32.mrb[17].mxu1  ;;  %v828_v23 = vadd.f32 %v1269_v19, %v1003_v20 }
 0x3c5   :  { %v1270_v22 = vpop.f32.mrb[18].mxu1  ;;  %v820_v27 = vadd.f32 %v1003_v20, %v819_v21 }
 0x3c6   :  { %v831_v24 = vadd.f32 %v1270_v22, %v1003_v20  ;;  %v822_v25 = vpop.f32.mrb[19].mxu1 }
 0x3c7   :  { %v823_v26 = vadd.f32 %v1003_v20, %v822_v25 }
 0x3c8   :  { %v1052_v28 = vpack.c.bf16 %v831_v24, %v828_v23 }
 0x3c9   :  { %v1047_v29 = vpack.c.bf16 %v823_v26, %v820_v27 }
 0x3ca   :  { %1084 = vst [vmem:[%s1598_s9 + $0x8] sm:$0xff] %v1052_v28  }
 0x3cb   :  { %1048 = vst [vmem:[%s1598_s9] sm:$0xff] %v1047_v29   ;;  %v1273_v30 = vpop.f32.mrb[20].mxu1 }
 0x3cc   :  { %v835_v31 = vpop.f32.mrb[21].mxu1  ;;  %v844_v33 = vadd.f32 %v1273_v30, %v1003_v20 }
 0x3cd   :  { %v1274_v32 = vpop.f32.mrb[22].mxu1  ;;  %v836_v36 = vadd.f32 %v1003_v20, %v835_v31 }
 0x3ce   :  { %v847_v34 = vadd.f32 %v1274_v32, %v1003_v20  ;;  %v838_v35 = vpop.f32.mrb[23].mxu1 }
 0x3cf   :  { %v839_v37 = vadd.f32 %v1003_v20, %v838_v35 }
 0x3d0   :  { %v1062_v38 = vpack.c.bf16 %v847_v34, %v844_v33 }
 0x3d1   :  { %v1057_v39 = vpack.c.bf16 %v839_v37, %v836_v36 }
 0x3d2   :  { %1086 = vst [vmem:[%s1598_s9 + $0x18] sm:$0xff] %v1062_v38  }
 0x3d3   :  { %1085 = vst [vmem:[%s1598_s9 + $0x10] sm:$0xff] %v1057_v39   ;;  %v1277_v40 = vpop.f32.mrb[24].mxu1 }
 0x3d4   :  { %v851_v41 = vpop.f32.mrb[25].mxu1  ;;  %v860_v43 = vadd.f32 %v1277_v40, %v1003_v20 }
 0x3d5   :  { %v1278_v42 = vpop.f32.mrb[26].mxu1  ;;  %v852_v46 = vadd.f32 %v1003_v20, %v851_v41 }
 0x3d6   :  { %v863_v44 = vadd.f32 %v1278_v42, %v1003_v20  ;;  %v854_v45 = vpop.f32.mrb[27].mxu1 }
 0x3d7   :  { %v855_v47 = vadd.f32 %v1003_v20, %v854_v45 }
 0x3d8   :  { %v1072_v48 = vpack.c.bf16 %v863_v44, %v860_v43 }
 0x3d9   :  { %v1067_v49 = vpack.c.bf16 %v855_v47, %v852_v46 }
 0x3da   :  { %1088 = vst [vmem:[%s1598_s9 + $0x28] sm:$0xff] %v1072_v48  }
 0x3db   :  { %1087 = vst [vmem:[%s1598_s9 + $0x20] sm:$0xff] %v1067_v49   ;;  %v1281_v50 = vpop.f32.mrb[28].mxu1 }
 0x3dc   :  { %v867_v51 = vpop.f32.mrb[29].mxu1  ;;  %v876_v53 = vadd.f32 %v1281_v50, %v1003_v20 }
 0x3dd   :  { %v1282_v52 = vpop.f32.mrb[30].mxu1  ;;  %v868_v56 = vadd.f32 %v1003_v20, %v867_v51 }
 0x3de   :  { %v879_v54 = vadd.f32 %v1282_v52, %v1003_v20  ;;  %v870_v55 = vpop.f32.mrb[31].mxu1 }
 0x3df   :  { %v871_v57 = vadd.f32 %v1003_v20, %v870_v55 }
 0x3e0   :  { %v1082_v58 = vpack.c.bf16 %v879_v54, %v876_v53 }
 0x3e1   :  { %v1077_v59 = vpack.c.bf16 %v871_v57, %v868_v56 }
 0x3e2   :  { %1090 = vst [vmem:[%s1598_s9 + $0x38] sm:$0xff] %v1082_v58  }
 0x3e3   :  { %1089 = vst [vmem:[%s1598_s9 + $0x30] sm:$0xff] %v1077_v59  }
 0x3e4   :  { %966 = vsyncpa [#allocation3], 1 }
 0x3e5   :  { %967 = vsyncpa [#allocation5], 1 }

</bundles_post_ra>
